<compile_context>
chip_gen: v6e
topology: v6e:2x2x1
jax: 0.10.0
libtpu: 0.0.40
codegen_flags: <defaults>
</compile_context>

<pallas_src>
import jax
import jax.numpy as jnp
from jax.experimental import pallas as pl
from jax.experimental.pallas import tpu as pltpu

CRITIC_SIZE_1 = 128
CRITIC_SIZE_2 = 128
BN_EPS = 1e-5

# Row indices inside the packed [8, 128] vector-parameter slab (rows 6-7 pad).
_ROW_G2, _ROW_BE2, _ROW_G3, _ROW_BE3, _ROW_W3, _ROW_B3 = 0, 1, 2, 3, 4, 5


def _bn_relu_train(x, gamma, beta, inv_b):
    """Training-mode BatchNorm1d + ReLU with one-pass stats and folded affine.

    mean = sum(x)/B, var = sum(x*x)/B - mean^2 (biased, eps=1e-5), then
    y = relu(x * scale + shift) with scale = gamma * rsqrt(var + eps),
    shift = beta - mean * scale.
    """
    s1 = jnp.sum(x, axis=0, keepdims=True)
    s2 = jnp.sum(x * x, axis=0, keepdims=True)
    mean = s1 * inv_b
    var = jnp.maximum(s2 * inv_b - mean * mean, 0.0)
    scale = jax.lax.rsqrt(var + BN_EPS) * gamma
    shift = beta - mean * scale
    return jnp.maximum(x * scale + shift, 0.0)


def critic_kernel(state_ref, action_ref, w_ref, vec_ref, out_ref):
    B, S = state_ref.shape
    A = action_ref.shape[1]
    H1, H2 = CRITIC_SIZE_1, CRITIC_SIZE_2
    inv_b = 1.0 / B

    state = state_ref[...]                       # [B, S]
    action = action_ref[...]                     # [B, A]
    vec = vec_ref[...]                           # [8, 128] packed vector params

    g2 = vec[_ROW_G2:_ROW_G2 + 1, :H1]
    be2 = vec[_ROW_BE2:_ROW_BE2 + 1, :H1]
    g3 = vec[_ROW_G3:_ROW_G3 + 1, :H2]
    be3 = vec[_ROW_BE3:_ROW_BE3 + 1, :H2]
    w3_row = vec[_ROW_W3:_ROW_W3 + 1, :H2]       # [1, H2]  (lin_3 weight row)
    b3 = vec[_ROW_B3:_ROW_B3 + 1, 0:1]           # [1, 1]   (lin_3 bias)

    # ---- layer 1: Linear(state -> H1); b1 omitted (cancelled by BN mean) ----
    h1 = jnp.dot(state, w_ref[0:S, :], preferred_element_type=jnp.float32)
    h1 = _bn_relu_train(h1, g2, be2, inv_b)

    # ---- layer 2: Linear(cat[h1, action] -> H2), concat fused via split W;
    #      b2 omitted (cancelled by BN mean) ----
    h2 = jnp.dot(h1, w_ref[S:S + H1, :], preferred_element_type=jnp.float32)
    h2 = h2 + jnp.dot(action, w_ref[S + H1:S + H1 + A, :],
                      preferred_element_type=jnp.float32)
    h2 = _bn_relu_train(h2, g3, be3, inv_b)

    # ---- layer 3: Linear(H2 -> 1) as VPU multiply + lane reduction ----
    q = jnp.sum(h2 * w3_row, axis=-1)            # [B]
    out_ref[...] = jnp.reshape(q, (1, B)) + b3   # [1, B] lane-dense store


def critic_forward(state, action, packed):
    B = state.shape[0]
    vmem = pl.BlockSpec(memory_space=pltpu.MemorySpace.VMEM)
    q_row = pl.pallas_call(
        critic_kernel,
        out_shape=jax.ShapeDtypeStruct((1, B), jnp.float32),
        in_specs=[vmem, vmem, vmem, vmem],
        out_specs=vmem,
    )(state, action, packed["w_slab"], packed["vec_slab"])
    # Kernel emits a lane-dense [1, B] row; present the module's [B, 1] shape.
    return q_row.reshape(B, 1)


def init_params(key, state_size, action_size):
    """Per-layer params mirroring the PyTorch module's initialize_params.

    Note: init_hidden_layers uses weight.size()[0], which for nn.Linear is the
    *output* dim, so lim = 1/sqrt(out_features) -- reproduced faithfully.
    Weights are stored as [in, out] (transposed vs PyTorch's [out, in]).
    """
    ks = jax.random.split(key, 6)
    H1, H2 = CRITIC_SIZE_1, CRITIC_SIZE_2

    lim1 = 1.0 / H1 ** 0.5
    lim2 = 1.0 / H2 ** 0.5
    lim3 = 0.003
    b1_lim = 1.0 / state_size ** 0.5
    b2_lim = 1.0 / (H1 + action_size) ** 0.5
    b3_lim = 1.0 / H2 ** 0.5

    w1 = jax.random.uniform(ks[0], (state_size, H1), jnp.float32, -lim1, lim1)
    b1 = jax.random.uniform(ks[1], (1, H1), jnp.float32, -b1_lim, b1_lim)
    w2 = jax.random.uniform(ks[2], (H1 + action_size, H2), jnp.float32,
                            -lim2, lim2)
    b2 = jax.random.uniform(ks[3], (1, H2), jnp.float32, -b2_lim, b2_lim)
    w3 = jax.random.uniform(ks[4], (H2, 1), jnp.float32, -lim3, lim3)
    b3 = jax.random.uniform(ks[5], (1, 1), jnp.float32, -b3_lim, b3_lim)

    # BatchNorm affine params (PyTorch default: gamma=1, beta=0).
    g2 = jnp.ones((1, H1), jnp.float32)
    be2 = jnp.zeros((1, H1), jnp.float32)
    g3 = jnp.ones((1, H2), jnp.float32)
    be3 = jnp.zeros((1, H2), jnp.float32)

    return dict(w1=w1, b1=b1, w2=w2, b2=b2, w3=w3, b3=b3,
                g2=g2, be2=be2, g3=g3, be3=be3)


def pack_params(p):
    """Pack per-layer params into the two DMA slabs the kernel consumes.

    w_slab [S+H1+A, 128]: rows [0,S)=W1, [S,S+H1)=W2 (h1 part), rest=W2
    (action part).  vec_slab [8, 128]: bn gammas/betas, W3 as a lane row, b3
    broadcast.  b1/b2 are intentionally not packed: training-mode BN subtracts
    the batch mean, which cancels any pre-BN per-feature bias exactly.
    """
    H2 = CRITIC_SIZE_2
    w_slab = jnp.concatenate([p["w1"], p["w2"]], axis=0).astype(jnp.float32)

    vec_slab = jnp.zeros((8, H2), jnp.float32)
    vec_slab = vec_slab.at[_ROW_G2].set(p["g2"][0])
    vec_slab = vec_slab.at[_ROW_BE2].set(p["be2"][0])
    vec_slab = vec_slab.at[_ROW_G3].set(p["g3"][0])
    vec_slab = vec_slab.at[_ROW_BE3].set(p["be3"][0])
    vec_slab = vec_slab.at[_ROW_W3].set(p["w3"][:, 0])
    vec_slab = vec_slab.at[_ROW_B3].set(jnp.full((H2,), p["b3"][0, 0]))
    return dict(w_slab=w_slab, vec_slab=vec_slab)


def _reference(state, action, p):
    """Plain-JAX replica of the PyTorch module (train-mode BN, biases kept)."""
    def bn(x, gamma, beta):
        mean = jnp.mean(x, axis=0, keepdims=True)
        var = jnp.mean((x - mean) ** 2, axis=0, keepdims=True)
        return (x - mean) * jax.lax.rsqrt(var + BN_EPS) * gamma + beta

    h1 = state @ p["w1"] + p["b1"]
    h1 = jnp.maximum(bn(h1, p["g2"], p["be2"]), 0.0)
    cat = jnp.concatenate([h1, action], axis=1)
    h2 = cat @ p["w2"] + p["b2"]
    h2 = jnp.maximum(bn(h2, p["g3"], p["be3"]), 0.0)
    return h2 @ p["w3"] + p["b3"]


if __name__ == "__main__":
    B, STATE_SIZE, ACTION_SIZE = 8, 16, 4
    key = jax.random.PRNGKey(0)
    k_state, k_action, k_params = jax.random.split(key, 3)

    state = jax.random.normal(k_state, (B, STATE_SIZE), jnp.float32)
    action = jax.random.normal(k_action, (B, ACTION_SIZE), jnp.float32)
    params = init_params(k_params, STATE_SIZE, ACTION_SIZE)
    packed = pack_params(params)

    q = critic_forward(state, action, packed)
    q = jax.block_until_ready(q)

    q_ref = _reference(state, action, params)
    assert q.shape == (B, 1)
    # Tolerance covers the exact-in-math but float-reordered simplifications
    # (dropped pre-BN biases, one-pass variance, VPU final dot).
    assert jnp.allclose(q, q_ref, atol=2e-4, rtol=1e-3), "mismatch vs reference"

    print("KERNEL_OK")
</pallas_src>

<mosaic_0001>
module attributes {stable_mosaic.version = 11 : i64} {
  func.func @critic_kernel(%arg0: memref<8x16xf32, #tpu.memory_space<vmem>>, %arg1: memref<8x4xf32, #tpu.memory_space<vmem>>, %arg2: memref<148x128xf32, #tpu.memory_space<vmem>>, %arg3: memref<8x128xf32, #tpu.memory_space<vmem>>, %arg4: memref<1x8xf32, #tpu.memory_space<vmem>>) attributes {dimension_semantics = [], scalar_prefetch = 0 : i64, scratch_operands = 0 : i64, tpu.core_type = #tpu.core_type<tc>} {
    %c0 = arith.constant 0 : index
    %c0_0 = arith.constant 0 : index
    %0 = vector.load %arg0[%c0, %c0_0] : memref<8x16xf32, #tpu.memory_space<vmem>>, vector<8x16xf32>
    %c0_1 = arith.constant 0 : index
    %c0_2 = arith.constant 0 : index
    %1 = vector.load %arg1[%c0_1, %c0_2] : memref<8x4xf32, #tpu.memory_space<vmem>>, vector<8x4xf32>
    %c0_3 = arith.constant 0 : index
    %c0_4 = arith.constant 0 : index
    %2 = vector.load %arg3[%c0_3, %c0_4] : memref<8x128xf32, #tpu.memory_space<vmem>>, vector<8x128xf32>
    %3 = vector.extract_strided_slice %2 {offsets = [0, 0], sizes = [1, 128], strides = [1, 1]} : vector<8x128xf32> to vector<1x128xf32>
    %4 = vector.extract_strided_slice %2 {offsets = [1, 0], sizes = [1, 128], strides = [1, 1]} : vector<8x128xf32> to vector<1x128xf32>
    %5 = vector.extract_strided_slice %2 {offsets = [2, 0], sizes = [1, 128], strides = [1, 1]} : vector<8x128xf32> to vector<1x128xf32>
    %6 = vector.extract_strided_slice %2 {offsets = [3, 0], sizes = [1, 128], strides = [1, 1]} : vector<8x128xf32> to vector<1x128xf32>
    %7 = vector.extract_strided_slice %2 {offsets = [4, 0], sizes = [1, 128], strides = [1, 1]} : vector<8x128xf32> to vector<1x128xf32>
    %8 = vector.extract_strided_slice %2 {offsets = [5, 0], sizes = [1, 1], strides = [1, 1]} : vector<8x128xf32> to vector<1x1xf32>
    %c0_5 = arith.constant 0 : index
    %c0_6 = arith.constant 0 : index
    %9 = vector.load %arg2[%c0_5, %c0_6] : memref<148x128xf32, #tpu.memory_space<vmem>>, vector<16x128xf32>
    %cst = arith.constant dense<0.000000e+00> : vector<8x128xf32>
    %10 = tpu.matmul %0, %9, %cst {dimension_numbers = #tpu.dot_dimension_numbers<[1], [0], [0], [1], [0, 0, 1, 1], [], []>} : vector<8x16xf32>, vector<16x128xf32>, vector<8x128xf32> -> vector<8x128xf32>
    %cst_7 = arith.constant dense<0.000000e+00> : vector<128xf32>
    %11 = vector.multi_reduction <add>, %10, %cst_7 [0] : vector<8x128xf32> to vector<128xf32>
    %12 = vector.shape_cast %11 : vector<128xf32> to vector<1x128xf32>
    %13 = arith.mulf %10, %10 : vector<8x128xf32>
    %cst_8 = arith.constant dense<0.000000e+00> : vector<128xf32>
    %14 = vector.multi_reduction <add>, %13, %cst_8 [0] : vector<8x128xf32> to vector<128xf32>
    %15 = vector.shape_cast %14 : vector<128xf32> to vector<1x128xf32>
    %cst_9 = arith.constant 1.250000e-01 : f32
    %16 = vector.broadcast %cst_9 : f32 to vector<1x128xf32>
    %17 = arith.mulf %12, %16 : vector<1x128xf32>
    %cst_10 = arith.constant 1.250000e-01 : f32
    %18 = vector.broadcast %cst_10 : f32 to vector<1x128xf32>
    %19 = arith.mulf %15, %18 : vector<1x128xf32>
    %20 = arith.mulf %17, %17 : vector<1x128xf32>
    %21 = arith.subf %19, %20 : vector<1x128xf32>
    %cst_11 = arith.constant 0.000000e+00 : f32
    %22 = vector.broadcast %cst_11 : f32 to vector<1x128xf32>
    %23 = arith.maximumf %21, %22 : vector<1x128xf32>
    %cst_12 = arith.constant 9.99999974E-6 : f32
    %24 = vector.broadcast %cst_12 : f32 to vector<1x128xf32>
    %25 = arith.addf %23, %24 : vector<1x128xf32>
    %26 = math.rsqrt %25 : vector<1x128xf32>
    %27 = arith.mulf %26, %3 : vector<1x128xf32>
    %28 = arith.mulf %17, %27 : vector<1x128xf32>
    %29 = arith.subf %4, %28 : vector<1x128xf32>
    %30 = vector.broadcast %27 : vector<1x128xf32> to vector<8x128xf32>
    %31 = arith.mulf %10, %30 : vector<8x128xf32>
    %32 = vector.broadcast %29 : vector<1x128xf32> to vector<8x128xf32>
    %33 = arith.addf %31, %32 : vector<8x128xf32>
    %cst_13 = arith.constant 0.000000e+00 : f32
    %34 = vector.broadcast %cst_13 : f32 to vector<8x128xf32>
    %35 = arith.maximumf %33, %34 : vector<8x128xf32>
    %c16 = arith.constant 16 : index
    %c0_14 = arith.constant 0 : index
    %36 = vector.load %arg2[%c16, %c0_14] : memref<148x128xf32, #tpu.memory_space<vmem>>, vector<128x128xf32>
    %cst_15 = arith.constant dense<0.000000e+00> : vector<8x128xf32>
    %37 = tpu.matmul %35, %36, %cst_15 {dimension_numbers = #tpu.dot_dimension_numbers<[1], [0], [0], [1], [0, 0, 1, 1], [], []>} : vector<8x128xf32>, vector<128x128xf32>, vector<8x128xf32> -> vector<8x128xf32>
    %c144 = arith.constant 144 : index
    %c0_16 = arith.constant 0 : index
    %38 = vector.load %arg2[%c144, %c0_16] : memref<148x128xf32, #tpu.memory_space<vmem>>, vector<4x128xf32>
    %cst_17 = arith.constant dense<0.000000e+00> : vector<8x128xf32>
    %39 = tpu.matmul %1, %38, %cst_17 {dimension_numbers = #tpu.dot_dimension_numbers<[1], [0], [0], [1], [0, 0, 1, 1], [], []>} : vector<8x4xf32>, vector<4x128xf32>, vector<8x128xf32> -> vector<8x128xf32>
    %40 = arith.addf %37, %39 : vector<8x128xf32>
    %cst_18 = arith.constant dense<0.000000e+00> : vector<128xf32>
    %41 = vector.multi_reduction <add>, %40, %cst_18 [0] : vector<8x128xf32> to vector<128xf32>
    %42 = vector.shape_cast %41 : vector<128xf32> to vector<1x128xf32>
    %43 = arith.mulf %40, %40 : vector<8x128xf32>
    %cst_19 = arith.constant dense<0.000000e+00> : vector<128xf32>
    %44 = vector.multi_reduction <add>, %43, %cst_19 [0] : vector<8x128xf32> to vector<128xf32>
    %45 = vector.shape_cast %44 : vector<128xf32> to vector<1x128xf32>
    %cst_20 = arith.constant 1.250000e-01 : f32
    %46 = vector.broadcast %cst_20 : f32 to vector<1x128xf32>
    %47 = arith.mulf %42, %46 : vector<1x128xf32>
    %cst_21 = arith.constant 1.250000e-01 : f32
    %48 = vector.broadcast %cst_21 : f32 to vector<1x128xf32>
    %49 = arith.mulf %45, %48 : vector<1x128xf32>
    %50 = arith.mulf %47, %47 : vector<1x128xf32>
    %51 = arith.subf %49, %50 : vector<1x128xf32>
    %cst_22 = arith.constant 0.000000e+00 : f32
    %52 = vector.broadcast %cst_22 : f32 to vector<1x128xf32>
    %53 = arith.maximumf %51, %52 : vector<1x128xf32>
    %cst_23 = arith.constant 9.99999974E-6 : f32
    %54 = vector.broadcast %cst_23 : f32 to vector<1x128xf32>
    %55 = arith.addf %53, %54 : vector<1x128xf32>
    %56 = math.rsqrt %55 : vector<1x128xf32>
    %57 = arith.mulf %56, %5 : vector<1x128xf32>
    %58 = arith.mulf %47, %57 : vector<1x128xf32>
    %59 = arith.subf %6, %58 : vector<1x128xf32>
    %60 = vector.broadcast %57 : vector<1x128xf32> to vector<8x128xf32>
    %61 = arith.mulf %40, %60 : vector<8x128xf32>
    %62 = vector.broadcast %59 : vector<1x128xf32> to vector<8x128xf32>
    %63 = arith.addf %61, %62 : vector<8x128xf32>
    %cst_24 = arith.constant 0.000000e+00 : f32
    %64 = vector.broadcast %cst_24 : f32 to vector<8x128xf32>
    %65 = arith.maximumf %63, %64 : vector<8x128xf32>
    %66 = vector.broadcast %7 : vector<1x128xf32> to vector<8x128xf32>
    %67 = arith.mulf %65, %66 : vector<8x128xf32>
    %cst_25 = arith.constant dense<0.000000e+00> : vector<8xf32>
    %68 = vector.multi_reduction <add>, %67, %cst_25 [1] : vector<8x128xf32> to vector<8xf32>
    %69 = vector.shape_cast %68 : vector<8xf32> to vector<1x8xf32>
    %70 = vector.broadcast %8 : vector<1x1xf32> to vector<1x8xf32>
    %71 = arith.addf %69, %70 : vector<1x8xf32>
    %c0_26 = arith.constant 0 : index
    %c0_27 = arith.constant 0 : index
    %72 = vector.load %arg4[%c0_26, %c0_27] : memref<1x8xf32, #tpu.memory_space<vmem>>, vector<1x8xf32>
    tpu.vector_store %arg4[%c0_26, %c0_27], %71 {strides = array<i32>} : memref<1x8xf32, #tpu.memory_space<vmem>>, vector<1x8xf32>,
    return
  }
}

</mosaic_0001>

<bundles_post_ra>
// kernel: tpu_custom_call.1
= control target key start
LH: loop header
LB: loop body
LE: loop exit
PB: predicated region body
PF: predicated region fallthrough
CT: control target
= control target key end

     0   :  { %9 = vsyncpa [#allocation3], 0  ;;  %s604_s0 = inlined_call_operand.vmem [shape: f32[8,16], index: 0, kind: input, shape index: {}]   ;;  %s605_s1 = inlined_call_operand.vmem [shape: f32[8,4], index: 1, kind: input, shape index: {}]   ;;  %s606_s2 = inlined_call_operand.hbm [shape: f32[148,128], index: 2, kind: input, shape index: {}]   ;;  %s607_s3 = inlined_call_operand.vmem [shape: f32[8,128], index: 3, kind: input, shape index: {}]   ;;  %s608_s4 = inlined_call_operand.hbm [shape: f32[1,8], index: 4, kind: output, shape index: {}]  }
   0x1   :  { %10 = vsyncpa [#allocation4], 0  ;;  %s524_s15 = smov [#allocation2]  }
   0x2   :  { %s20_s16 = sshll.u32 %s524_s15, 4  ;;  %s21_s16 = int_to_ptr.vmem [resolvable:$true] %s20_s16 }
   0x3   :  { %s488_s17 = scalar_lea.vmem %s21_s16, 2432  ;;  %p493_p1 = scmp.lt.s32.totalorder %s21_s16, %s21_s16 }
   0x4   :  { %p489_p0 = scmp.ne.s32.totalorder %s21_s16, %s488_s17  ;;  %p494_p2 = scmp.lt.s32.totalorder %s488_s17, %s488_s17 }
   0x6   :  { %p495_p3 = por %p494_p2, %p493_p1 }
   0x8   :  { %p496_p4 = pnand %p495_p3, %p489_p0 }
   0xa   :  { %499 = shalt.err (!%p496_p4)
}
   0xb   :  { %s525_s18 = smov 128   ;;  %s526_s19 = smov 8  }
   0xc   :  { %26 = dma.hbm_to_vmem [thread:$0]  %s606_s2, 2432, %s21_s16, [#allocation3], %s525_s18, %s525_s18, %s526_s19  }
   0xd   :  { %520 = dma.done.wait [#allocation3], 2432  }
   0xe   :  { %521 = vsyncadd [#allocation3], 4294964864  ;;  %v527_v0 = vmov 0.0   ;;  %vm528_vm0 = vmmov 0   ;;  %v36_v1 = vld [vmem:[#allocation2 + $0x8] sm:$0xff]  ;;  %v35_v2 = vld [vmem:[#allocation2] sm:$0xff]  ;;  %v137_v43 = vlaneseq }
   0xf   :  { %420 = vmatprep.subr.mxu0 %v527_v0  ;;  %424 = vmatprep.mubr.msk.f32.mxu0 %vm528_vm0, %v527_v0  ;;  %v32_v3 = vld [vmem:[%s604_s0] sm:$0xff]  ;;  %vm37_vm1 = vcmask 130048   ;;  %v163_v4 = vld [vmem:[#allocation2 + $0x88] sm:$0xff]  ;;  %v161_v6 = vld [vmem:[#allocation2 + $0x78] sm:$0xff]  ;;  %vm169_vm2 = vcmask 1043456   ;;  %vm165_vm3 = vcmask 31744  }
  0x10   :  { %432 = vmatprep.subr.mxu1 %v527_v0  ;;  %464 = vmatprep.mubr.msk.f32.mxu1 %vm528_vm0, %v527_v0  ;;  %v162_v5 = vld [vmem:[#allocation2 + $0x80] sm:$0xff]  ;;  %v160_v7 = vld [vmem:[#allocation2 + $0x70] sm:$0xff]  ;;  %v159_v8 = vld [vmem:[#allocation2 + $0x68] sm:$0xff]  ;;  %v588_v44 = vshrl.u32 %v137_v43, 7  ;;  %v529_v60 = vmov 0   ;;  %vm378_vm4 = vcmask 57344  }
  0x11   :  { %421 = vmatpush3.msra.mxu0 %v36_v1  ;;  %433 = vmatpush3.msra.mxu1 %v163_v4  ;;  %v158_v9 = vld [vmem:[#allocation2 + $0x60] sm:$0xff]  ;;  %v157_v10 = vld [vmem:[#allocation2 + $0x58] sm:$0xff]  ;;  %v156_v11 = vld [vmem:[#allocation2 + $0x50] sm:$0xff] }
  0x12   :  { %422 = vmatprep.subr.mxu0 %v527_v0  ;;  %434 = vmatprep.subr.mxu1 %v527_v0  ;;  %v155_v12 = vld [vmem:[#allocation2 + $0x48] sm:$0xff]  ;;  %v154_v13 = vld [vmem:[#allocation2 + $0x40] sm:$0xff]  ;;  %v153_v14 = vld [vmem:[#allocation2 + $0x38] sm:$0xff]  ;;  %v139_v48 = vsub.s32 0, %v588_v44  ;;  %v144_v52 = vsub.s32 1, %v588_v44 }
  0x13   :  { %423 = vmatpush3.msra.mxu0 %v35_v2  ;;  %435 = vmatpush3.msra.mxu1 %v162_v5  ;;  %v152_v15 = vld [vmem:[#allocation2 + $0x30] sm:$0xff]  ;;  %v151_v16 = vld [vmem:[#allocation2 + $0x28] sm:$0xff]  ;;  %v33_v18 = vld [vmem:[%s605_s1] sm:$0xff] }
  0x14   :  { %425 = vmatmul.mubr.msk.f32.vlgmr.msra.gmra.mxu0 %vm37_vm1, %v32_v3  ;;  %427 = vmatprep.subr.mxu0 %v527_v0  ;;  %v164_v17 = vld [vmem:[#allocation2 + $0x90] sm:$0xf]  ;;  %v150_v19 = vld [vmem:[#allocation2 + $0x20] sm:$0xff]  ;;  %v149_v20 = vld [vmem:[#allocation2 + $0x18] sm:$0xff] }
  0x15   :  { %429 = vmatprep.mubr.msk.f32.mxu0 %vm528_vm0, %v527_v0  ;;  %436 = vmatprep.subr.mxu1 %v527_v0  ;;  %v148_v21 = vld [vmem:[#allocation2 + $0x10] sm:$0xff]  ;;  %v34_v45 = vld [vmem:[%s607_s3] sm:$0xff]  ;;  %s530_s3 = smov [#allocation5]  }
  0x16   :  { %437 = vmatpush3.msra.mxu1 %v161_v6  ;;  %428 = vmatpush3.msk.msra.mxu0 %vm169_vm2, %v164_v17  ;;  %s386_s25 = sshll.u32 %s530_s3, 4  ;;  %s387_s25 = int_to_ptr.vmem [resolvable:$true] %s386_s25 }
  0x17   :  { %438 = vmatprep.subr.mxu1 %v527_v0  ;;  %474 = vset.pattern.permute.xlu0 %v529_v60  ;;  %s500_s26 = scalar_lea.vmem %s387_s25, 16  ;;  %s504_s27 = scalar_lea.vmem %s387_s25, 32 }
  0x18   :  { %439 = vmatpush3.msra.mxu1 %v160_v7  ;;  %430 = vmatmul.mubr.msk.f32.vlgmr.msra.gmra.mxu0 %vm165_vm3, %v33_v18  ;;  %p501_p5 = scmp.ne.s32.totalorder %s387_s25, %s500_s26  ;;  %p505_p6 = scmp.lt.s32.totalorder %s387_s25, %s387_s25 }
  0x19   :  { %440 = vmatprep.subr.mxu1 %v527_v0  ;;  %475 = vset.pattern.permute.xlu1 %v529_v60  ;;  %p506_p7 = scmp.lt.s32.totalorder %s504_s27, %s500_s26 }
  0x1a   :  { %441 = vmatpush3.msra.mxu1 %v159_v8 }
  0x1b   :  { %442 = vmatprep.subr.mxu1 %v527_v0  ;;  %p507_p8 = por %p506_p7, %p505_p6 }
  0x1c   :  { %443 = vmatpush3.msra.mxu1 %v158_v9 }
  0x1d   :  { %444 = vmatprep.subr.mxu1 %v527_v0  ;;  %p508_p9 = pnand %p507_p8, %p501_p5 }
  0x1e   :  { %445 = vmatpush3.msra.mxu1 %v157_v10 }
  0x1f   :  { %446 = vmatprep.subr.mxu1 %v527_v0 }
  0x20   :  { %447 = vmatpush3.msra.mxu1 %v156_v11 }
  0x21   :  { %448 = vmatprep.subr.mxu1 %v527_v0 }
  0x22   :  { %449 = vmatpush3.msra.mxu1 %v155_v12 }
  0x23   :  { %450 = vmatprep.subr.mxu1 %v527_v0 }
  0x24   :  { %451 = vmatpush3.msra.mxu1 %v154_v13 }
  0x25   :  { %452 = vmatprep.subr.mxu1 %v527_v0 }
  0x26   :  { %453 = vmatpush3.msra.mxu1 %v153_v14 }
  0x27   :  { %454 = vmatprep.subr.mxu1 %v527_v0 }
  0x28   :  { %455 = vmatpush3.msra.mxu1 %v152_v15 }
  0x29   :  { %456 = vmatprep.subr.mxu1 %v527_v0 }
  0x2a   :  { %457 = vmatpush3.msra.mxu1 %v151_v16 }
  0x2b   :  { %458 = vmatprep.subr.mxu1 %v527_v0 }
  0x2c   :  { %459 = vmatpush3.msra.mxu1 %v150_v19 }
  0x2d   :  { %460 = vmatprep.subr.mxu1 %v527_v0 }
  0x2e   :  { %461 = vmatpush3.msra.mxu1 %v149_v20 }
  0x2f   :  { %462 = vmatprep.subr.mxu1 %v527_v0 }
  0x30   :  { %463 = vmatpush3.msra.mxu1 %v148_v21  ;;  %v341_v21 = vsub.s32 2, %v588_v44 }
  0xd4   :  { %v107_v22 = vpop.f32.mrf.mxu0 }
  0xd5   :  { %v111_v23 = vrot.slane %v107_v22, 4  ;;  %v117_v24 = vmul.f32 %v107_v22, %v107_v22 }
  0xd6   :  { %v426_v25 = vpop.f32.mrf.mxu0 }
  0xd7   :  { %v112_v26 = vadd.f32 %v111_v23, %v107_v22  ;;  %v118_v27 = vrot.slane %v117_v24, 4  ;;  %v346_v25 = vsub.s32 3, %v588_v44 }
  0xd8   :  { %v239_v58 = vpop.f32.mrf.mxu0 }
  0xd9   :  { %v113_v28 = vrot.slane %v112_v26, 2  ;;  %v119_v29 = vadd.f32 %v118_v27, %v117_v24  ;;  %v352_v27 = vsub.s32 4, %v588_v44 }
  0xda   :  { %v431_v59 = vpop.f32.mrf.mxu0 }
  0xdb   :  { %v114_v30 = vadd.f32 %v113_v28, %v112_v26  ;;  %v120_v31 = vrot.slane %v119_v29, 2 }
  0xdd   :  { %v115_v32 = vrot.slane %v114_v30, 1  ;;  %v121_v33 = vadd.f32 %v120_v31, %v119_v29  ;;  %v353_v31 = vrot.slane %v34_v45, %v352_v27 }
  0xdf   :  { %v116_v34 = vadd.f32 %v115_v32, %v114_v30  ;;  %v122_v35 = vrot.slane %v121_v33, 1 }
  0xe1   :  { %v123_v36 = vadd.f32 %v122_v35, %v121_v33  ;;  %v124_v37 = vmul.f32 0.125, %v116_v34  ;;  %v363_v35 = vsub.s32 5, %v588_v44 }
  0xe3   :  { %v125_v38 = vmul.f32 0.125, %v123_v36  ;;  %v126_v39 = vmul.f32 %v124_v37, %v124_v37 }
  0xe5   :  { %v127_v40 = vsub.f32 %v125_v38, %v126_v39  ;;  %v372_v39 = vand.u32 127, %v137_v43 }
  0xe7   :  { %v128_v41 = vmax.f32 %v127_v40, 0.0  ;;  %v375_v40 = vsub.s32 %v372_v39, %v588_v44 }
  0xe9   :  { %v129_v42 = vadd.f32 1e-05, %v128_v41 }
  0xeb   :  { %476 = vrsqrt.f32 %v129_v42 }
  0xf8   :  { %v477_v46 = vpop.eup %476 }
  0xf9   :  { %v131_v47 = vmul.f32 %v477_v46, %v34_v45 }
  0xfb   :  { %v132_v49 = vmul.f32 %v131_v47, %v124_v37  ;;  %v140_v50 = vrot.slane %v131_v47, %v139_v48 }
  0xfd   :  { %v134_v51 = vrot.slane %v132_v49, 7  ;;  %v141_v54 = vmul.f32 %v140_v50, %v107_v22 }
  0xff   :  { %v136_v53 = vsub.f32 %v34_v45, %v134_v51 }
 0x101   :  { %v145_v55 = vrot.slane %v136_v53, %v144_v52 }
 0x103   :  { %v146_v56 = vadd.f32 %v145_v55, %v141_v54 }
 0x105   :  { %v147_v57 = vmax.f32 %v146_v56, 0.0 }
 0x107   :  { %465 = vmatmul.mubr.f32.vlgmr.msra.gmra.mxu1 %v147_v57 }
 0x1c7   :  { %v309_v61 = vpop.f32.mrf.mxu1 }
 0x1c8   :  { %v310_v62 = vadd.f32 %v309_v61, %v239_v58 }
 0x1c9   :  { %v466_v63 = vpop.f32.mrf.mxu1 }
 0x1ca   :  { %v313_v0 = vrot.slane %v310_v62, 4  ;;  %v319_v1 = vmul.f32 %v310_v62, %v310_v62 }
 0x1cc   :  { %v314_v2 = vadd.f32 %v313_v0, %v310_v62  ;;  %v320_v3 = vrot.slane %v319_v1, 4 }
 0x1ce   :  { %v315_v4 = vrot.slane %v314_v2, 2  ;;  %v321_v5 = vadd.f32 %v320_v3, %v319_v1 }
 0x1d0   :  { %v316_v6 = vadd.f32 %v315_v4, %v314_v2  ;;  %v322_v7 = vrot.slane %v321_v5, 2 }
 0x1d2   :  { %v317_v8 = vrot.slane %v316_v6, 1  ;;  %v323_v9 = vadd.f32 %v322_v7, %v321_v5 }
 0x1d4   :  { %v324_v10 = vrot.slane %v323_v9, 1  ;;  %v318_v11 = vadd.f32 %v317_v8, %v316_v6 }
 0x1d6   :  { %v325_v12 = vadd.f32 %v324_v10, %v323_v9  ;;  %v326_v13 = vmul.f32 0.125, %v318_v11 }
 0x1d8   :  { %v327_v14 = vmul.f32 0.125, %v325_v12  ;;  %v328_v15 = vmul.f32 %v326_v13, %v326_v13 }
 0x1da   :  { %v329_v16 = vsub.f32 %v327_v14, %v328_v15 }
 0x1dc   :  { %v330_v17 = vmax.f32 %v329_v16, 0.0 }
 0x1de   :  { %v331_v18 = vadd.f32 1e-05, %v330_v17 }
 0x1e0   :  { %478 = vrsqrt.f32 %v331_v18 }
 0x1ed   :  { %v479_v19 = vpop.eup %478 }
 0x1ee   :  { %v333_v20 = vmul.f32 %v479_v19, %v34_v45 }
 0x1f0   :  { %v334_v22 = vmul.f32 %v333_v20, %v326_v13  ;;  %v342_v24 = vrot.slane %v333_v20, %v341_v21 }
 0x1f2   :  { %v336_v23 = vrot.slane %v334_v22, 7  ;;  %v343_v28 = vmul.f32 %v342_v24, %v310_v62 }
 0x1f4   :  { %v338_v26 = vsub.f32 %v34_v45, %v336_v23 }
 0x1f6   :  { %v347_v29 = vrot.slane %v338_v26, %v346_v25 }
 0x1f8   :  { %v348_v30 = vadd.f32 %v347_v29, %v343_v28 }
 0x1fa   :  { %v349_v32 = vmax.f32 %v348_v30, 0.0 }
 0x1fc   :  { %v354_v33 = vmul.f32 %v353_v31, %v349_v32 }
 0x1fe   :  { %355 = vadd.xlane.f32.xlu0 %v354_v33 }
 0x214   :  { %359 = vperm.xlu0 %474, %v34_v45  }
 0x287   :  { %v356_v34 = vpop.xlane.xlu0 %355 }
 0x28f   :  { %v360_v36 = vpop.permute.xlu0 %359 }
 0x290   :  { %v364_v37 = vrot.slane %v360_v36, %v363_v35 }
 0x292   :  { %v366_v38 = vadd.f32 %v364_v37, %v356_v34 }
 0x294   :  { %369 = vperm.xlu1 %475, %v366_v38  }
 0x30f   :  { %v370_v41 = vpop.permute.xlu1 %369 }
 0x310   :  { %v376_v42 = vrot.slane %v370_v41, %v375_v40 }
 0x312   :  { %379 = vst.msk [vmem:[#allocation5] sm:$0x1] %vm378_vm4, %v376_v42 }
 0x313   :  { %511 = shalt.err (!%p508_p9)
}
 0x314   :  { %389 = dma.vmem_to_hbm [thread:$0]  %s387_s25, 16, %s608_s4, [#allocation4]  }
 0x315   :  { %522 = dma.done.wait [#allocation4], 16  }
 0x316   :  { %523 = vsyncadd [#allocation4], 4294967280 }
 0x317   :  { %393 = vsyncpa [#allocation3], 1 }
 0x318   :  { %394 = vsyncpa [#allocation4], 1 }

</bundles_post_ra>
